<compile_context>
chip_gen: v5e
topology: v5e:2x2
jax: 0.10.0
libtpu: 0.0.40
codegen_flags: <defaults>
</compile_context>

<pallas_src>
import functools

import jax
import jax.numpy as jnp
from jax.experimental import pallas as pl
from jax.experimental.pallas import tpu as pltpu


def _round_up(x, m):
    return ((x + m - 1) // m) * m


def _rl_agent_kernel(x_ref, w1_ref, b1_ref, w2_ref, b2_ref, w3_ref, b3_ref,
                     out_ref, *, action_size):
    cdt = w1_ref.dtype  # bf16 matmul operands; accumulation stays f32

    x = x_ref[...].astype(cdt)

    # Fused actor+critic trunk: two 128-wide Linear+ReLU layers (f32 accum).
    h = jnp.dot(x, w1_ref[...], preferred_element_type=jnp.float32) + b1_ref[...]
    h = jnp.maximum(h, 0.0)
    h = jnp.dot(h.astype(cdt), w2_ref[...],
                preferred_element_type=jnp.float32) + b2_ref[...]
    h = jnp.maximum(h, 0.0)

    # Fused heads: lanes [0, action_size) = actor logits, lane action_size =
    # critic value, remaining lanes are zero-padded.
    y = jnp.dot(h.astype(cdt), w3_ref[...],
                preferred_element_type=jnp.float32) + b3_ref[...]

    # (1, out_pad) lane masks; broadcast against (tb, out_pad) in the selects.
    lane = jax.lax.broadcasted_iota(jnp.int32, (1, y.shape[-1]), 1)
    is_action = lane < action_size
    is_value = lane == action_size

    # Numerically stable softmax restricted to the action lanes: pad lanes and
    # the value lane are masked to -inf so exp() contributes exactly 0 there.
    logits = jnp.where(is_action, y, -jnp.inf)
    m = jnp.max(logits, axis=-1, keepdims=True)
    e = jnp.exp(logits - m)
    denom = jnp.sum(e, axis=-1, keepdims=True)
    # Exact reciprocal on a (tb, 1) denom: negligible cost, probs sum to 1.
    probs = e * (1.0 / denom)

    # probs is exactly 0 on every non-action lane, so just add the value lane.
    out_ref[...] = probs + jnp.where(is_value, y, 0.0)


def fuse_params(p, action_size=3, out_pad=8, weight_dtype=jnp.bfloat16):
    """Fuse actor/critic weights into three matrices feeding one MXU trunk."""
    state_size, hidden = p["aw1"].shape
    width = 2 * hidden  # 128 for hidden=64
    assert out_pad >= action_size + 1

    w1 = jnp.concatenate([p["aw1"], p["cw1"]], axis=1)            # (S, 128)
    b1 = jnp.concatenate([p["ab1"], p["cb1"]], axis=1)            # (1, 128)

    w2 = jnp.zeros((width, width), jnp.float32)                   # block-diag
    w2 = w2.at[:hidden, :hidden].set(p["aw2"])
    w2 = w2.at[hidden:, hidden:].set(p["cw2"])
    b2 = jnp.concatenate([p["ab2"], p["cb2"]], axis=1)            # (1, 128)

    w3 = jnp.zeros((width, out_pad), jnp.float32)                 # (128, 8)
    w3 = w3.at[:hidden, :action_size].set(p["aw3"])
    w3 = w3.at[hidden:, action_size:action_size + 1].set(p["cw3"])
    b3 = jnp.zeros((1, out_pad), jnp.float32)
    b3 = b3.at[:, :action_size].set(p["ab3"])
    b3 = b3.at[:, action_size:action_size + 1].set(p["cb3"])

    # bf16 matmul operands (f32 accumulation in-kernel); biases stay f32.
    return (w1.astype(weight_dtype), b1, w2.astype(weight_dtype), b2,
            w3.astype(weight_dtype), b3)


def simple_rl_agent_forward(state, fused, action_size=3, batch_tile=1024):
    """Fused SimpleRLAgent forward.

    state: (batch, state_size) float32
    fused: tuple from fuse_params(params)
    Returns (action_probs (batch, action_size), state_value (batch, 1)).
    """
    batch, state_size = state.shape
    w1, b1, w2, b2, w3, b3 = fused
    width = w1.shape[1]
    out_pad = w3.shape[1]

    # Pad only to the sublane multiple (8); never to a full tile multiple.
    padded = _round_up(batch, 8)
    if padded != batch:
        state = jnp.pad(state, ((0, padded - batch), (0, 0)))

    # Large batch tiles amortize per-step overhead, but split so the
    # "parallel" batch axis gets >= 2 grid steps whenever there is enough
    # work (both TensorCores busy on v7x).  Partial last blocks are handled
    # by BlockSpec edge masking.
    half = _round_up(max(padded // 2, 8), 8)
    tb = min(batch_tile, half)
    grid = (pl.cdiv(padded, tb),)

    weight_bytes = sum(int(a.size) * a.dtype.itemsize
                       for a in (w1, b1, w2, b2, w3, b3))
    cost = pl.CostEstimate(
        flops=2 * padded * (state_size * width + width * width + width * out_pad),
        transcendentals=padded * out_pad,                       # exp
        bytes_accessed=4 * padded * (state_size + out_pad) + weight_bytes,
    )

    const_spec = lambda shape: pl.BlockSpec(shape, lambda i: (0, 0))

    # NOTE: the constant-index weight specs could use
    # pipeline_mode=pl.Buffered(1) (fetched once); omitted for portability --
    # the default double buffer costs < 100 KiB of VMEM here.
    out = pl.pallas_call(
        functools.partial(_rl_agent_kernel, action_size=action_size),
        out_shape=jax.ShapeDtypeStruct((padded, out_pad), jnp.float32),
        grid=grid,
        in_specs=[
            pl.BlockSpec((tb, state_size), lambda i: (i, 0)),   # streamed
            const_spec(w1.shape), const_spec(b1.shape),         # VMEM-resident
            const_spec(w2.shape), const_spec(b2.shape),
            const_spec(w3.shape), const_spec(b3.shape),
        ],
        out_specs=pl.BlockSpec((tb, out_pad), lambda i: (i, 0)),
        compiler_params=pltpu.CompilerParams(
            dimension_semantics=("parallel",),
        ),
        cost_estimate=cost,
    )(state, w1, b1, w2, b2, w3, b3)

    probs = out[:batch, :action_size]
    value = out[:batch, action_size:action_size + 1]
    return probs, value


def init_params(key, state_size=10, hidden_size=64, action_size=3):
    """Deterministic synthetic parameters (weights stored as (in, out))."""
    keys = jax.random.split(key, 12)

    def lin(kw, kb, fan_in, fan_out):
        w = jax.random.normal(kw, (fan_in, fan_out), jnp.float32) / jnp.sqrt(fan_in)
        b = jax.random.normal(kb, (1, fan_out), jnp.float32) * 0.01
        return w, b

    aw1, ab1 = lin(keys[0], keys[1], state_size, hidden_size)
    aw2, ab2 = lin(keys[2], keys[3], hidden_size, hidden_size)
    aw3, ab3 = lin(keys[4], keys[5], hidden_size, action_size)
    cw1, cb1 = lin(keys[6], keys[7], state_size, hidden_size)
    cw2, cb2 = lin(keys[8], keys[9], hidden_size, hidden_size)
    cw3, cb3 = lin(keys[10], keys[11], hidden_size, 1)

    return dict(
        aw1=aw1, ab1=ab1, aw2=aw2, ab2=ab2, aw3=aw3, ab3=ab3,
        cw1=cw1, cb1=cb1, cw2=cw2, cb2=cb2, cw3=cw3, cb3=cb3,
    )


def _reference_forward(state, p):
    """Pure-JAX f32 reference of the PyTorch forward (unfused weights)."""
    h = jax.nn.relu(state @ p["aw1"] + p["ab1"])
    h = jax.nn.relu(h @ p["aw2"] + p["ab2"])
    probs = jax.nn.softmax(h @ p["aw3"] + p["ab3"], axis=-1)
    g = jax.nn.relu(state @ p["cw1"] + p["cb1"])
    g = jax.nn.relu(g @ p["cw2"] + p["cb2"])
    value = g @ p["cw3"] + p["cb3"]
    return probs, value


if __name__ == "__main__":
    key = jax.random.PRNGKey(0)
    k_params, k_state = jax.random.split(key)

    batch, state_size, hidden_size, action_size = 8, 10, 64, 3
    params = init_params(k_params, state_size, hidden_size, action_size)
    state = jax.random.normal(k_state, (batch, state_size), jnp.float32)

    fused = fuse_params(params, action_size)
    probs, value = simple_rl_agent_forward(state, fused, action_size)
    probs = jax.block_until_ready(probs)
    value = jax.block_until_ready(value)

    ref_probs, ref_value = _reference_forward(state, params)
    assert probs.shape == (batch, action_size)
    assert value.shape == (batch, 1)
    # bf16 matmul operands (f32 accumulation) -> looser tolerance vs the pure
    # f32 reference.  The softmax itself is exact f32, so probs sum to 1.
    assert jnp.allclose(probs, ref_probs, atol=5e-2, rtol=5e-2)
    assert jnp.allclose(value, ref_value, atol=5e-2, rtol=5e-2)
    assert jnp.allclose(jnp.sum(probs, axis=-1), 1.0, atol=1e-4)

    # Awkward batch: not a multiple of 8 nor of the tile -> only sublane
    # padding + a partial edge block (no tile-multiple host-side padding).
    batch2 = 20
    state2 = jax.random.normal(jax.random.PRNGKey(1), (batch2, state_size),
                               jnp.float32)
    probs2, value2 = simple_rl_agent_forward(state2, fused, action_size)
    probs2 = jax.block_until_ready(probs2)
    value2 = jax.block_until_ready(value2)
    ref_probs2, ref_value2 = _reference_forward(state2, params)
    assert probs2.shape == (batch2, action_size)
    assert value2.shape == (batch2, 1)
    assert jnp.allclose(probs2, ref_probs2, atol=5e-2, rtol=5e-2)
    assert jnp.allclose(value2, ref_value2, atol=5e-2, rtol=5e-2)
    assert jnp.allclose(jnp.sum(probs2, axis=-1), 1.0, atol=1e-4)

    print("KERNEL_OK")
</pallas_src>

<mosaic_0001>
module attributes {stable_mosaic.version = 11 : i64} {
  func.func @_rl_agent_kernel(%arg0: i32, %arg1: memref<8x10xf32, #tpu.memory_space<vmem>>, %arg2: memref<10x128xbf16, #tpu.memory_space<vmem>>, %arg3: memref<1x128xf32, #tpu.memory_space<vmem>>, %arg4: memref<128x128xbf16, #tpu.memory_space<vmem>>, %arg5: memref<1x128xf32, #tpu.memory_space<vmem>>, %arg6: memref<128x8xbf16, #tpu.memory_space<vmem>>, %arg7: memref<1x8xf32, #tpu.memory_space<vmem>>, %arg8: memref<8x8xf32, #tpu.memory_space<vmem>>) attributes {dimension_semantics = [#tpu.dimension_semantics<parallel>], iteration_bounds = array<i64: 1>, scalar_prefetch = 0 : i64, scratch_operands = 0 : i64, tpu.core_type = #tpu.core_type<tc>, window_params = [{transform_indices = @transform_0, window_bounds = array<i64: 8, 10>}, {pipeline_mode = #tpu.pipeline_mode<synchronous>, transform_indices = @transform_1, window_bounds = array<i64: 10, 128>}, {pipeline_mode = #tpu.pipeline_mode<synchronous>, transform_indices = @transform_2, window_bounds = array<i64: 1, 128>}, {pipeline_mode = #tpu.pipeline_mode<synchronous>, transform_indices = @transform_3, window_bounds = array<i64: 128, 128>}, {pipeline_mode = #tpu.pipeline_mode<synchronous>, transform_indices = @transform_4, window_bounds = array<i64: 1, 128>}, {pipeline_mode = #tpu.pipeline_mode<synchronous>, transform_indices = @transform_5, window_bounds = array<i64: 128, 8>}, {pipeline_mode = #tpu.pipeline_mode<synchronous>, transform_indices = @transform_6, window_bounds = array<i64: 1, 8>}, {transform_indices = @transform_7, window_bounds = array<i64: 8, 8>}]} {
    %c0 = arith.constant 0 : index
    %c0_0 = arith.constant 0 : index
    %0 = vector.load %arg1[%c0, %c0_0] : memref<8x10xf32, #tpu.memory_space<vmem>>, vector<8x10xf32>
    %1 = arith.truncf %0 : vector<8x10xf32> to vector<8x10xbf16>
    %c0_1 = arith.constant 0 : index
    %c0_2 = arith.constant 0 : index
    %2 = vector.load %arg2[%c0_1, %c0_2] : memref<10x128xbf16, #tpu.memory_space<vmem>>, vector<10x128xbf16>
    %cst = arith.constant dense<0.000000e+00> : vector<8x128xf32>
    %3 = tpu.matmul %1, %2, %cst {dimension_numbers = #tpu.dot_dimension_numbers<[1], [0], [0], [1], [0, 0, 1, 1], [], []>} : vector<8x10xbf16>, vector<10x128xbf16>, vector<8x128xf32> -> vector<8x128xf32>
    %c0_3 = arith.constant 0 : index
    %c0_4 = arith.constant 0 : index
    %4 = vector.load %arg3[%c0_3, %c0_4] : memref<1x128xf32, #tpu.memory_space<vmem>>, vector<1x128xf32>
    %5 = vector.broadcast %4 : vector<1x128xf32> to vector<8x128xf32>
    %6 = arith.addf %3, %5 : vector<8x128xf32>
    %cst_5 = arith.constant 0.000000e+00 : f32
    %7 = vector.broadcast %cst_5 : f32 to vector<8x128xf32>
    %8 = arith.maximumf %6, %7 : vector<8x128xf32>
    %9 = arith.truncf %8 : vector<8x128xf32> to vector<8x128xbf16>
    %c0_6 = arith.constant 0 : index
    %c0_7 = arith.constant 0 : index
    %10 = vector.load %arg4[%c0_6, %c0_7] : memref<128x128xbf16, #tpu.memory_space<vmem>>, vector<128x128xbf16>
    %cst_8 = arith.constant dense<0.000000e+00> : vector<8x128xf32>
    %11 = tpu.matmul %9, %10, %cst_8 {dimension_numbers = #tpu.dot_dimension_numbers<[1], [0], [0], [1], [0, 0, 1, 1], [], []>} : vector<8x128xbf16>, vector<128x128xbf16>, vector<8x128xf32> -> vector<8x128xf32>
    %c0_9 = arith.constant 0 : index
    %c0_10 = arith.constant 0 : index
    %12 = vector.load %arg5[%c0_9, %c0_10] : memref<1x128xf32, #tpu.memory_space<vmem>>, vector<1x128xf32>
    %13 = vector.broadcast %12 : vector<1x128xf32> to vector<8x128xf32>
    %14 = arith.addf %11, %13 : vector<8x128xf32>
    %cst_11 = arith.constant 0.000000e+00 : f32
    %15 = vector.broadcast %cst_11 : f32 to vector<8x128xf32>
    %16 = arith.maximumf %14, %15 : vector<8x128xf32>
    %17 = arith.truncf %16 : vector<8x128xf32> to vector<8x128xbf16>
    %c0_12 = arith.constant 0 : index
    %c0_13 = arith.constant 0 : index
    %18 = vector.load %arg6[%c0_12, %c0_13] : memref<128x8xbf16, #tpu.memory_space<vmem>>, vector<128x8xbf16>
    %cst_14 = arith.constant dense<0.000000e+00> : vector<8x8xf32>
    %19 = tpu.matmul %17, %18, %cst_14 {dimension_numbers = #tpu.dot_dimension_numbers<[1], [0], [0], [1], [0, 0, 1, 1], [], []>} : vector<8x128xbf16>, vector<128x8xbf16>, vector<8x8xf32> -> vector<8x8xf32>
    %c0_15 = arith.constant 0 : index
    %c0_16 = arith.constant 0 : index
    %20 = vector.load %arg7[%c0_15, %c0_16] : memref<1x8xf32, #tpu.memory_space<vmem>>, vector<1x8xf32>
    %21 = vector.broadcast %20 : vector<1x8xf32> to vector<8x8xf32>
    %22 = arith.addf %19, %21 : vector<8x8xf32>
    %23 = tpu.iota {dimensions = array<i32: 1>} : vector<1x8xi32>
    %c3_i32 = arith.constant 3 : i32
    %24 = vector.broadcast %c3_i32 : i32 to vector<1x8xi32>
    %25 = arith.cmpi slt, %23, %24 : vector<1x8xi32>
    %c3_i32_17 = arith.constant 3 : i32
    %26 = vector.broadcast %c3_i32_17 : i32 to vector<1x8xi32>
    %27 = arith.cmpi eq, %23, %26 : vector<1x8xi32>
    %cst_18 = arith.constant 0xFF800000 : f32
    %28 = vector.shape_cast %25 : vector<1x8xi1> to vector<1x8xi1>
    %29 = vector.broadcast %28 : vector<1x8xi1> to vector<8x8xi1>
    %30 = vector.broadcast %cst_18 : f32 to vector<8x8xf32>
    %31 = arith.select %29, %22, %30 : vector<8x8xi1>, vector<8x8xf32>
    %cst_19 = arith.constant dense<0xFF800000> : vector<8xf32>
    %32 = vector.multi_reduction <maximumf>, %31, %cst_19 [1] : vector<8x8xf32> to vector<8xf32>
    %33 = vector.shape_cast %32 : vector<8xf32> to vector<8x1xf32>
    %34 = vector.broadcast %33 : vector<8x1xf32> to vector<8x8xf32>
    %35 = arith.subf %31, %34 : vector<8x8xf32>
    %36 = math.exp %35 : vector<8x8xf32>
    %cst_20 = arith.constant dense<0.000000e+00> : vector<8xf32>
    %37 = vector.multi_reduction <add>, %36, %cst_20 [1] : vector<8x8xf32> to vector<8xf32>
    %38 = vector.shape_cast %37 : vector<8xf32> to vector<8x1xf32>
    %cst_21 = arith.constant 1.000000e+00 : f32
    %39 = vector.broadcast %cst_21 : f32 to vector<8x1xf32>
    %40 = arith.divf %39, %38 : vector<8x1xf32>
    %41 = vector.broadcast %40 : vector<8x1xf32> to vector<8x8xf32>
    %42 = arith.mulf %36, %41 : vector<8x8xf32>
    %cst_22 = arith.constant 0.000000e+00 : f32
    %43 = vector.shape_cast %27 : vector<1x8xi1> to vector<1x8xi1>
    %44 = vector.broadcast %43 : vector<1x8xi1> to vector<8x8xi1>
    %45 = vector.broadcast %cst_22 : f32 to vector<8x8xf32>
    %46 = arith.select %44, %22, %45 : vector<8x8xi1>, vector<8x8xf32>
    %47 = arith.addf %42, %46 : vector<8x8xf32>
    %c0_23 = arith.constant 0 : index
    %c0_24 = arith.constant 0 : index
    %48 = vector.load %arg8[%c0_23, %c0_24] : memref<8x8xf32, #tpu.memory_space<vmem>>, vector<8x8xf32>
    tpu.vector_store %arg8[%c0_23, %c0_24], %47 {strides = array<i32>} : memref<8x8xf32, #tpu.memory_space<vmem>>, vector<8x8xf32>,
    return
  }
  func.func @transform_0(%arg0: i32) -> (i32, i32) {
    %c0_i32 = arith.constant 0 : i32
    %c0_i32_0 = arith.constant 0 : i32
    return %arg0, %c0_i32 : i32, i32
  }
  func.func @transform_1(%arg0: i32) -> (i32, i32) {
    %c0_i32 = arith.constant 0 : i32
    %c0_i32_0 = arith.constant 0 : i32
    %c0_i32_1 = arith.constant 0 : i32
    return %c0_i32, %c0_i32_0 : i32, i32
  }
  func.func @transform_2(%arg0: i32) -> (i32, i32) {
    %c0_i32 = arith.constant 0 : i32
    %c0_i32_0 = arith.constant 0 : i32
    %c0_i32_1 = arith.constant 0 : i32
    return %c0_i32, %c0_i32_0 : i32, i32
  }
  func.func @transform_3(%arg0: i32) -> (i32, i32) {
    %c0_i32 = arith.constant 0 : i32
    %c0_i32_0 = arith.constant 0 : i32
    %c0_i32_1 = arith.constant 0 : i32
    return %c0_i32, %c0_i32_0 : i32, i32
  }
  func.func @transform_4(%arg0: i32) -> (i32, i32) {
    %c0_i32 = arith.constant 0 : i32
    %c0_i32_0 = arith.constant 0 : i32
    %c0_i32_1 = arith.constant 0 : i32
    return %c0_i32, %c0_i32_0 : i32, i32
  }
  func.func @transform_5(%arg0: i32) -> (i32, i32) {
    %c0_i32 = arith.constant 0 : i32
    %c0_i32_0 = arith.constant 0 : i32
    %c0_i32_1 = arith.constant 0 : i32
    return %c0_i32, %c0_i32_0 : i32, i32
  }
  func.func @transform_6(%arg0: i32) -> (i32, i32) {
    %c0_i32 = arith.constant 0 : i32
    %c0_i32_0 = arith.constant 0 : i32
    %c0_i32_1 = arith.constant 0 : i32
    return %c0_i32, %c0_i32_0 : i32, i32
  }
  func.func @transform_7(%arg0: i32) -> (i32, i32) {
    %c0_i32 = arith.constant 0 : i32
    %c0_i32_0 = arith.constant 0 : i32
    return %arg0, %c0_i32 : i32, i32
  }
}

</mosaic_0001>

<bundles_post_ra>
// kernel: tpu_custom_call.1
= control target key start
LH: loop header
LB: loop body
LE: loop exit
PB: predicated region body
PF: predicated region fallthrough
CT: control target
= control target key end

     0   :  { %12 = vsyncpa [#allocation3], 0  ;;  %s604_s0 = inlined_call_operand.hbm [shape: f32[8,10], index: 0, kind: input, shape index: {}]   ;;  %s605_s1 = inlined_call_operand.hbm [shape: bf16[10,128], index: 1, kind: input, shape index: {}]   ;;  %s606_s2 = inlined_call_operand.vmem [shape: f32[1,128], index: 2, kind: input, shape index: {}]   ;;  %s607_s3 = inlined_call_operand.vmem [shape: bf16[128,128], index: 3, kind: input, shape index: {}]   ;;  %s608_s4 = inlined_call_operand.vmem [shape: f32[1,128], index: 4, kind: input, shape index: {}]   ;;  %s609_s5 = inlined_call_operand.vmem [shape: bf16[128,8], index: 5, kind: input, shape index: {}]   ;;  %s610_s6 = inlined_call_operand.vmem [shape: f32[1,8], index: 6, kind: input, shape index: {}]   ;;  %s611_s7 = inlined_call_operand.hbm [shape: f32[8,8], index: 7, kind: output, shape index: {}]  }
   0x1   :  { %13 = vsyncpa [#allocation6], 0 }
   0x2   :  { %14 = vsyncpa [#allocation4], 0  ;;  %s20_s26 = sshll.u32 %s604_s0, 4  ;;  %s490_s27 = smov [#allocation2]   ;;  %s21_s26 = int_to_ptr.hbm [resolvable:$true] %s20_s26 }
   0x3   :  { %s22_s28 = sshll.u32 %s490_s27, 4  ;;  %s30_s8 = sshll.u32 %s605_s1, 4  ;;  %s23_s28 = int_to_ptr.vmem [resolvable:$true] %s22_s28  ;;  %s31_s8 = int_to_ptr.hbm [resolvable:$true] %s30_s8 }
   0x4   :  { %25 = dma.hbm_to_vmem [thread:$0]  %s21_s26, 128, %s23_s28, [#allocation3]  }
   0x5   :  { %s491_s9 = smov [#allocation5]   ;;  %s492_s11 = smov 64  }
   0x6   :  { %s32_s10 = sshll.u32 %s491_s9, 4  ;;  %s493_s12 = smov 4   ;;  %s33_s10 = int_to_ptr.vmem [resolvable:$true] %s32_s10 }
   0x7   :  { %38 = dma.hbm_to_vmem [thread:$0]  %s31_s8, 128, %s33_s10, [#allocation6], %s492_s11, %s492_s11, %s493_s12  }
   0x8   :  { %484 = dma.done.wait [#allocation3], 128  }
   0x9   :  { %485 = vsyncadd [#allocation3], 4294967168 }
   0xa   :  { %486 = dma.done.wait [#allocation6], 128  }
   0xb   :  { %487 = vsyncadd [#allocation6], 4294967168  ;;  %v316_v0 = vld [vmem:[#allocation5] sm:$0xf]  ;;  %v383_v1 = vld [vmem:[#allocation5] sm:$0x10]  ;;  %v258_v34 = vlaneseq }
   0xc   :  { %vm75_vm0 = vcmask 1044480   ;;  %v58_v2 = vld [vmem:[#allocation2] sm:$0xff]  ;;  %v317_v3 = vor.u32 %v383_v1, %v316_v0  ;;  %v391_v4 = vld [vmem:[%s607_s3 + $0x38] sm:$0xff]  ;;  %v390_v7 = vld [vmem:[%s607_s3 + $0x30] sm:$0xff]  ;;  %vm71_vm1 = vcmask 80896   ;;  %vm265_vm4 = vcmask 64512  }
   0xd   :  { %v59_v6 = vpack.c.bf16 %v58_v2, %v58_v2  ;;  %162 = vmatpush.bf16.msra.mxu1 %v391_v4  ;;  %v389_v8 = vld [vmem:[%s607_s3 + $0x28] sm:$0xff]  ;;  %v388_v9 = vld [vmem:[%s607_s3 + $0x20] sm:$0xff]  ;;  %v387_v10 = vld [vmem:[%s607_s3 + $0x18] sm:$0xff]  ;;  %v259_v35 = vand.u32 127, %v258_v34  ;;  %s303_s23 = sshll.u32 %s611_s7, 4  ;;  %s304_s23 = int_to_ptr.hbm [resolvable:$true] %s303_s23 }
   0xe   :  { %v77_v5 = vsel %vm75_vm0, %v317_v3, 0  ;;  %v386_v11 = vld [vmem:[%s607_s3 + $0x10] sm:$0xff]  ;;  %v385_v12 = vld [vmem:[%s607_s3 + $0x8] sm:$0xff]  ;;  %v384_v13 = vld [vmem:[%s607_s3] sm:$0xff] }
   0xf   :  { %86 = vmatpush.bf16.msra.mxu0 %v77_v5  ;;  %v399_v14 = vld [vmem:[%s609_s5 + $0x38] sm:$0xff]  ;;  %v398_v15 = vld [vmem:[%s609_s5 + $0x30] sm:$0xff]  ;;  %v397_v16 = vld [vmem:[%s609_s5 + $0x28] sm:$0xff]  ;;  %vm261_vm2 = vcmp.eq.s32.totalorder %v259_v35, 3  ;;  %vm260_vm3 = vcmp.lt.s32.totalorder %v259_v35, 3 }
  0x10   :  { %245 = vmatpush.bf16.msra.mxu2 %v399_v14  ;;  %v396_v17 = vld [vmem:[%s609_s5 + $0x20] sm:$0xff]  ;;  %v395_v18 = vld [vmem:[%s609_s5 + $0x18] sm:$0xff]  ;;  %v394_v19 = vld [vmem:[%s609_s5 + $0x10] sm:$0xff] }
  0x11   :  { %163 = vmatpush.bf16.msra.mxu1 %v390_v7  ;;  %v405_v20 = vld [vmem:[%s606_s2] ss:$0 sm:$0xff]  ;;  %v393_v26 = vld [vmem:[%s609_s5 + $0x8] sm:$0xff] }
  0x12   :  { %318 = vmatmul.msk.bf16.vlgmr.msra.gmra.mxu0 %vm71_vm1, %v59_v6  ;;  %v392_v27 = vld [vmem:[%s609_s5] sm:$0xff] }
  0x13   :  { %v406_v28 = vld [vmem:[%s608_s4] ss:$0 sm:$0xff]  ;;  %s494_s4 = smov [#allocation7]  }
  0x14   :  { %246 = vmatpush.bf16.msra.mxu2 %v398_v15  ;;  %v407_v36 = vld [vmem:[%s610_s6] ss:$0 sm:$0xff]  ;;  %s301_s5 = sshll.u32 %s494_s4, 4  ;;  %s302_s5 = int_to_ptr.vmem [resolvable:$true] %s301_s5 }
  0x15   :  { %164 = vmatpush.bf16.msra.mxu1 %v389_v8 }
  0x18   :  { %247 = vmatpush.bf16.msra.mxu2 %v397_v16 }
  0x19   :  { %165 = vmatpush.bf16.msra.mxu1 %v388_v9 }
  0x1c   :  { %248 = vmatpush.bf16.msra.mxu2 %v396_v17 }
  0x1d   :  { %166 = vmatpush.bf16.msra.mxu1 %v387_v10 }
  0x20   :  { %249 = vmatpush.bf16.msra.mxu2 %v395_v18 }
  0x21   :  { %167 = vmatpush.bf16.msra.mxu1 %v386_v11 }
  0x24   :  { %250 = vmatpush.bf16.msra.mxu2 %v394_v19 }
  0x25   :  { %168 = vmatpush.bf16.msra.mxu1 %v385_v12 }
  0x28   :  { %251 = vmatpush.bf16.msra.mxu2 %v393_v26 }
  0x29   :  { %169 = vmatpush.bf16.msra.mxu1 %v384_v13 }
  0x2c   :  { %252 = vmatpush.bf16.msra.mxu2 %v392_v27 }
  0x8f   :  { %v88_v21 = vpop.f32.mrf.mxu0 }
  0x90   :  { %v89_v22 = vadd.f32 %v405_v20, %v88_v21 }
  0x92   :  { %v92_v23 = vmax.f32 %v89_v22, 0.0 }
  0x94   :  { %v93_v24 = vpack.c.bf16 %v92_v23, %v92_v23 }
  0x96   :  { %170 = vmatmul.bf16.vlgmr.msra.gmra.mxu1 %v93_v24 }
  0x97   :  { %v90_v25 = vpop.f32.mrf.mxu0 }
 0x113   :  { %v171_v29 = vpop.f32.mrf.mxu1 }
 0x114   :  { %v172_v30 = vadd.f32 %v406_v28, %v171_v29 }
 0x116   :  { %v175_v31 = vmax.f32 %v172_v30, 0.0 }
 0x118   :  { %v176_v32 = vpack.c.bf16 %v175_v31, %v175_v31 }
 0x11a   :  { %253 = vmatmul.bf16.vlgmr.msra.gmra.mxu2 %v176_v32 }
 0x11b   :  { %v173_v33 = vpop.f32.mrf.mxu1 }
 0x19d   :  { %v254_v37 = vpop.f32.mrf.mxu2 }
 0x19e   :  { %v255_v38 = vadd.f32 %v407_v36, %v254_v37 }
 0x1a0   :  { %v293_v39 = vsel %vm261_vm2, %v255_v38, 0.0  ;;  %v264_v40 = vsel %vm260_vm3, %v255_v38, -inf }
 0x1a1   :  { %v266_v41 = vsel %vm265_vm4, %v264_v40, -inf }
 0x1a2   :  { %267 = vmax.xlane.f32.xlu0 %v266_v41 }
 0x1a5   :  { %v256_v42 = vpop.f32.mrf.mxu2 }
 0x215   :  { %v268_v43 = vpop.xlane.xlu0 %267 }
 0x216   :  { %v269_v44 = vsub.f32 %v264_v40, %v268_v43 }
 0x218   :  { %v270_v45 = vmul.f32 1.442695, %v269_v44 }
 0x21a   :  { %408 = vpow2.f32 %v270_v45 }
 0x220   :  { %v409_v46 = vpop.eup %408 }
 0x221   :  { %v272_v47 = vsel %vm265_vm4, %v409_v46, 0.0 }
 0x222   :  { %273 = vadd.xlane.f32.xlu0 %v272_v47 }
 0x295   :  { %v274_v48 = vpop.xlane.xlu0 %273 }
 0x296   :  { %410 = vrcp.f32 %v274_v48  ;;  %v286_v52 = vand.u32 2147483648, %v274_v48  ;;  %v284_v54 = vand.u32 2147483647, %v274_v48  ;;  %vm280_vm6 = vweird.f32 %v274_v48 }
 0x298   :  { %v287_v56 = vor.u32 1.1754944e-38, %v286_v52  ;;  %vm285_vm8 = vcmp.eq.f32.partialorder %v284_v54, 8.507059e+37 }
 0x29c   :  { %v411_v49 = vpop.eup %410 }
 0x29d   :  { %v276_v50 = vmul.f32 %v411_v49, %v274_v48  ;;  %vm281_vm5 = vweird.f32 %v411_v49 }
 0x29e   :  { %vm282_vm7 = vmor %vm280_vm6, %vm281_vm5 }
 0x29f   :  { %v277_v51 = vsub.f32 1.0, %v276_v50 }
 0x2a1   :  { %v278_v53 = vmul.f32 %v411_v49, %v277_v51 }
 0x2a3   :  { %v279_v55 = vadd.f32 %v411_v49, %v278_v53 }
 0x2a5   :  { %v283_v57 = vsel %vm282_vm7, %v411_v49, %v279_v55 }
 0x2a6   :  { %v288_v58 = vsel %vm285_vm8, %v287_v56, %v283_v57 }
 0x2a7   :  { %v290_v59 = vmul.f32 %v409_v46, %v288_v58 }
 0x2a9   :  { %v294_v60 = vadd.f32 %v293_v39, %v290_v59 }
 0x2ab   :  { %295 = vst.msk [vmem:[#allocation7] sm:$0xff] %vm265_vm4, %v294_v60 }
 0x2ac   :  { %306 = dma.vmem_to_hbm [thread:$0]  %s302_s5, 128, %s304_s23, [#allocation4]  }
 0x2ad   :  { %488 = dma.done.wait [#allocation4], 128  }
 0x2ae   :  { %489 = vsyncadd [#allocation4], 4294967168 }
 0x2af   :  { %311 = vsyncpa [#allocation3], 1 }
 0x2b0   :  { %312 = vsyncpa [#allocation6], 1 }
 0x2b1   :  { %313 = vsyncpa [#allocation4], 1 }

</bundles_post_ra>
